<compile_context>
chip_gen: v7x
topology: tpu7x:2x2x1
jax: 0.10.0
libtpu: 0.0.40
codegen_flags: <defaults>
</compile_context>

<pallas_src>
import jax
import jax.numpy as jnp
from jax.experimental import pallas as pl
from jax.experimental.pallas import tpu as pltpu  # noqa: F401  (TPU backend)


def _mlp_kernel(x_ref, w1_ref, b1_ref, w2_ref, b2_ref, o_ref):
    # x_ref:  (B, Dp) f32    w1_ref: (Dp, H) bf16   b1_ref: (1, H) f32
    # w2_ref: (1, H)  f32    b2_ref: (1, 1)  f32    o_ref:  (B, 1) f32

    # fc1: in-kernel bf16 cast of x (idle VALU), bf16 MXU matmul with f32 accumulation,
    # then bias + ReLU in f32.
    x_bf = x_ref[...].astype(jnp.bfloat16)
    h = jnp.dot(x_bf, w1_ref[...], preferred_element_type=jnp.float32)
    h = jnp.maximum(h + b1_ref[...], 0.0)

    # dropout: eval-mode => identity

    # fc2 (H -> 1): VPU elementwise mul + XLU cross-lane reduce (skip the MXU).
    y = jnp.sum(h * w2_ref[...], axis=-1, keepdims=True) + b2_ref[...]
    o_ref[...] = jax.nn.sigmoid(y)


def prepare_params(w1, b1, w2, b2):
    """One-time weight prep, hoisted out of the per-call path.

    w1: (D, H) f32 -> zero-padded to (Dp, H) bf16, Dp = round_up(D, 128).
    b1 -> (1, H) f32, w2: (H, 1) -> (1, H) f32 row, b2 -> (1, 1) f32.
    """
    D, H = w1.shape
    O = w2.shape[1]
    Dp = ((D + 127) // 128) * 128
    pad = Dp - D
    w1_p = jnp.pad(w1, ((0, pad), (0, 0))) if pad else w1
    w1_bf = w1_p.astype(jnp.bfloat16)          # halves the dominant HBM read
    b1_2d = b1.reshape(1, H).astype(jnp.float32)
    w2_row = w2.reshape(1, H).astype(jnp.float32)
    b2_2d = b2.reshape(1, O).astype(jnp.float32)
    return w1_bf, b1_2d, w2_row, b2_2d


@jax.jit
def simple_beehive_net(x, w1_bf, b1_2d, w2_row, b2_2d):
    """x: (B, *) flattened to (B, D). Params must come from prepare_params. Returns (B, 1)."""
    B = x.shape[0]
    Dp, H = w1_bf.shape
    O = b2_2d.shape[1]

    x2d = x.reshape(B, -1).astype(jnp.float32)
    D = x2d.shape[1]
    pad = Dp - D
    if pad:
        # Zero pads contribute 0 to the dot; keeps the MXU contraction lane-dense.
        x2d = jnp.pad(x2d, ((0, 0), (0, pad)))

    # Advisory cost hint: the kernel is a ~0.3 MiB DMA + a sliver of MXU/VPU work.
    flops = 2 * B * Dp * H + 2 * B * H
    bytes_accessed = (
        x2d.size * 4 + w1_bf.size * 2
        + b1_2d.size * 4 + w2_row.size * 4 + b2_2d.size * 4
        + B * O * 4
    )
    cost = pl.CostEstimate(flops=flops, transcendentals=B * O,
                           bytes_accessed=bytes_accessed)

    # Single-block kernel: everything fits comfortably in VMEM (< 0.5 MiB) on every
    # generation, including v7x's 64 MiB.
    return pl.pallas_call(
        _mlp_kernel,
        out_shape=jax.ShapeDtypeStruct((B, O), jnp.float32),
        in_specs=[
            pl.BlockSpec((B, Dp), lambda: (0, 0)),
            pl.BlockSpec((Dp, H), lambda: (0, 0)),
            pl.BlockSpec((1, H), lambda: (0, 0)),
            pl.BlockSpec((1, H), lambda: (0, 0)),
            pl.BlockSpec((1, O), lambda: (0, 0)),
        ],
        out_specs=pl.BlockSpec((B, O), lambda: (0, 0)),
        cost_estimate=cost,
    )(x2d, w1_bf, b1_2d, w2_row, b2_2d)


def init_params(key, input_size, hidden_size, output_size):
    # Deterministic init mimicking nn.Linear's U(-1/sqrt(fan_in), 1/sqrt(fan_in)).
    k1, k2, k3, k4 = jax.random.split(key, 4)
    bound1 = 1.0 / jnp.sqrt(input_size)
    bound2 = 1.0 / jnp.sqrt(hidden_size)
    # stored transposed relative to PyTorch: (in, out)
    w1 = jax.random.uniform(k1, (input_size, hidden_size), jnp.float32, -bound1, bound1)
    b1 = jax.random.uniform(k2, (1, hidden_size), jnp.float32, -bound1, bound1)
    w2 = jax.random.uniform(k3, (hidden_size, output_size), jnp.float32, -bound2, bound2)
    b2 = jax.random.uniform(k4, (1, output_size), jnp.float32, -bound2, bound2)
    return w1, b1, w2, b2


if __name__ == "__main__":
    INPUT_SIZE = 13 * 157   # 2041, as in the module default
    HIDDEN = 64
    OUT = 1
    BATCH = 8

    key = jax.random.PRNGKey(0)
    kx, kp = jax.random.split(key)
    # Input shaped like a (B, 13, 157) spectrogram-ish tensor; forward flattens it.
    x = jax.random.normal(kx, (BATCH, 13, 157), dtype=jnp.float32)
    w1, b1, w2, b2 = init_params(kp, INPUT_SIZE, HIDDEN, OUT)

    # One-time weight prep (hoisted out of the per-call path).
    prepped = prepare_params(w1, b1, w2, b2)
    prepped = jax.block_until_ready(prepped)
    w1_bf, b1_2d, w2_row, b2_2d = prepped

    out = simple_beehive_net(x, w1_bf, b1_2d, w2_row, b2_2d)
    out = jax.block_until_ready(out)
    assert out.shape == (BATCH, OUT)

    # Reference 1: same bf16-quantized math outside Pallas (tight tolerance).
    x2d = x.reshape(BATCH, -1)
    Dp = ((INPUT_SIZE + 127) // 128) * 128
    x_p = jnp.pad(x2d, ((0, 0), (0, Dp - INPUT_SIZE))).astype(jnp.bfloat16)
    w1_p = jnp.pad(w1, ((0, Dp - INPUT_SIZE), (0, 0))).astype(jnp.bfloat16)
    h_ref = jnp.maximum(
        jnp.dot(x_p, w1_p, preferred_element_type=jnp.float32) + b1, 0.0)
    ref_q = jax.nn.sigmoid(jnp.sum(h_ref * w2.reshape(1, HIDDEN), axis=-1,
                                   keepdims=True) + b2)
    assert jnp.allclose(out, ref_q, atol=2e-3, rtol=2e-3)

    # Reference 2: full-f32 math (loose tolerance, bf16 quantization error only).
    ref_f32 = jax.nn.sigmoid(jnp.maximum(x2d @ w1 + b1, 0.0) @ w2 + b2)
    assert jnp.allclose(out, ref_f32, atol=2e-2, rtol=2e-2)

    print("KERNEL_OK")
</pallas_src>

<mosaic_0001>
module attributes {stable_mosaic.version = 11 : i64} {
  func.func @_mlp_kernel(%arg0: memref<8x2048xf32, #tpu.memory_space<vmem>>, %arg1: memref<2048x64xbf16, #tpu.memory_space<vmem>>, %arg2: memref<1x64xf32, #tpu.memory_space<vmem>>, %arg3: memref<1x64xf32, #tpu.memory_space<vmem>>, %arg4: memref<1x1xf32, #tpu.memory_space<vmem>>, %arg5: memref<8x1xf32, #tpu.memory_space<vmem>>) attributes {dimension_semantics = [], scalar_prefetch = 0 : i64, scratch_operands = 0 : i64, tpu.core_type = #tpu.core_type<tc>} {
    %c0 = arith.constant 0 : index
    %c0_0 = arith.constant 0 : index
    %0 = vector.load %arg0[%c0, %c0_0] : memref<8x2048xf32, #tpu.memory_space<vmem>>, vector<8x2048xf32>
    %1 = arith.truncf %0 : vector<8x2048xf32> to vector<8x2048xbf16>
    %c0_1 = arith.constant 0 : index
    %c0_2 = arith.constant 0 : index
    %2 = vector.load %arg1[%c0_1, %c0_2] : memref<2048x64xbf16, #tpu.memory_space<vmem>>, vector<2048x64xbf16>
    %cst = arith.constant dense<0.000000e+00> : vector<8x64xf32>
    %3 = tpu.matmul %1, %2, %cst {dimension_numbers = #tpu.dot_dimension_numbers<[1], [0], [0], [1], [0, 0, 1, 1], [], []>} : vector<8x2048xbf16>, vector<2048x64xbf16>, vector<8x64xf32> -> vector<8x64xf32>
    %c0_3 = arith.constant 0 : index
    %c0_4 = arith.constant 0 : index
    %4 = vector.load %arg2[%c0_3, %c0_4] : memref<1x64xf32, #tpu.memory_space<vmem>>, vector<1x64xf32>
    %5 = vector.broadcast %4 : vector<1x64xf32> to vector<8x64xf32>
    %6 = arith.addf %3, %5 : vector<8x64xf32>
    %cst_5 = arith.constant 0.000000e+00 : f32
    %7 = vector.broadcast %cst_5 : f32 to vector<8x64xf32>
    %8 = arith.maximumf %6, %7 : vector<8x64xf32>
    %c0_6 = arith.constant 0 : index
    %c0_7 = arith.constant 0 : index
    %9 = vector.load %arg3[%c0_6, %c0_7] : memref<1x64xf32, #tpu.memory_space<vmem>>, vector<1x64xf32>
    %10 = vector.broadcast %9 : vector<1x64xf32> to vector<8x64xf32>
    %11 = arith.mulf %8, %10 : vector<8x64xf32>
    %cst_8 = arith.constant dense<0.000000e+00> : vector<8xf32>
    %12 = vector.multi_reduction <add>, %11, %cst_8 [1] : vector<8x64xf32> to vector<8xf32>
    %13 = vector.shape_cast %12 : vector<8xf32> to vector<8x1xf32>
    %c0_9 = arith.constant 0 : index
    %c0_10 = arith.constant 0 : index
    %14 = vector.load %arg4[%c0_9, %c0_10] : memref<1x1xf32, #tpu.memory_space<vmem>>, vector<1x1xf32>
    %15 = vector.broadcast %14 : vector<1x1xf32> to vector<8x1xf32>
    %16 = arith.addf %13, %15 : vector<8x1xf32>
    %17 = arith.negf %16 : vector<8x1xf32>
    %18 = math.exp %17 : vector<8x1xf32>
    %cst_11 = arith.constant 1.000000e+00 : f32
    %19 = vector.broadcast %cst_11 : f32 to vector<8x1xf32>
    %20 = arith.addf %19, %18 : vector<8x1xf32>
    %21 = arith.divf %19, %20 : vector<8x1xf32>
    %c0_12 = arith.constant 0 : index
    %c0_13 = arith.constant 0 : index
    %22 = vector.load %arg5[%c0_12, %c0_13] : memref<8x1xf32, #tpu.memory_space<vmem>>, vector<8x1xf32>
    tpu.vector_store %arg5[%c0_12, %c0_13], %21 {strides = array<i32>} : memref<8x1xf32, #tpu.memory_space<vmem>>, vector<8x1xf32>,
    return
  }
}

</mosaic_0001>

<bundles_post_ra>
// kernel: simple_beehive_net.1
= control target key start
LH: loop header
LB: loop body
LE: loop exit
PB: predicated region body
PF: predicated region fallthrough
CT: control target
= control target key end

     0   :  { %vm1415_vm0 = vcmask 523264   ;;  %vm1433_vm1 = vcmask 7168   ;;  %s2353_s1 = inlined_call_operand.vmem [shape: bf16[2048,64], index: 1, kind: input, shape index: {}]   ;;  %s2354_s0 = inlined_call_operand.vmem [shape: f32[8,2048], index: 0, kind: input, shape index: {}]   ;;  %s2355_s4 = inlined_call_operand.<no memory space> [shape: f32[1,1], index: 4, kind: input, shape index: {}]   ;;  %s2356_s2 = inlined_call_operand.vmem [shape: f32[1,64], index: 2, kind: input, shape index: {}]   ;;  %s2357_s3 = inlined_call_operand.vmem [shape: f32[1,64], index: 3, kind: input, shape index: {}]   ;;  %s2358_s5 = inlined_call_operand.vmem [shape: f32[8,1], index: 5, kind: output, shape index: {}]  }
   0x1   :  { %v1747_v0 = vld [vmem:[%s2353_s1 + $0x40] sm:$0xff]   ;;  %v1751_v4 = vld [vmem:[%s2353_s1 + $0x48] sm:$0xff]   ;;  %v1755_v8 = vld [vmem:[%s2353_s1 + $0x50] sm:$0xff]  }
   0x2   :  { %v1748_v1 = vld [vmem:[%s2353_s1 + $0xc0] sm:$0xff]   ;;  %1571 = vmatprep.subr.bf16.mxu0 %v1747_v0  ;;  %v1752_v5 = vld [vmem:[%s2353_s1 + $0xc8] sm:$0xff]   ;;  %v1756_v9 = vld [vmem:[%s2353_s1 + $0xd0] sm:$0xff]  }
   0x3   :  { %v1749_v2 = vld [vmem:[%s2353_s1] sm:$0xff]   ;;  %1593 = vmatprep.subr.bf16.mxu1 %v1748_v1  ;;  %v1753_v6 = vld [vmem:[%s2353_s1 + $0x8] sm:$0xff]   ;;  %v1757_v10 = vld [vmem:[%s2353_s1 + $0x10] sm:$0xff]  }
   0x4   :  { %v1750_v3 = vld [vmem:[%s2353_s1 + $0x80] sm:$0xff]   ;;  %1572 = vmatpush3.bf16.msra.mxu0 %v1749_v2  ;;  %v1754_v7 = vld [vmem:[%s2353_s1 + $0x88] sm:$0xff]   ;;  %v1758_v11 = vld [vmem:[%s2353_s1 + $0x90] sm:$0xff]  }
   0x5   :  { %1594 = vmatpush3.bf16.msra.mxu1 %v1750_v3  ;;  %1573 = vmatprep.subr.bf16.mxu0 %v1751_v4  ;;  %v1759_v12 = vld [vmem:[%s2353_s1 + $0x58] sm:$0xff]   ;;  %v1763_v16 = vld [vmem:[%s2353_s1 + $0x60] sm:$0xff]   ;;  %v1767_v20 = vld [vmem:[%s2353_s1 + $0x68] sm:$0xff]  }
   0x6   :  { %1595 = vmatprep.subr.bf16.mxu1 %v1752_v5  ;;  %v1760_v13 = vld [vmem:[%s2353_s1 + $0xd8] sm:$0xff]   ;;  %v1764_v17 = vld [vmem:[%s2353_s1 + $0xe0] sm:$0xff]   ;;  %v1768_v21 = vld [vmem:[%s2353_s1 + $0xe8] sm:$0xff]  }
   0x7   :  { %v1761_v14 = vld [vmem:[%s2353_s1 + $0x18] sm:$0xff]   ;;  %v1765_v18 = vld [vmem:[%s2353_s1 + $0x20] sm:$0xff]   ;;  %v1769_v22 = vld [vmem:[%s2353_s1 + $0x28] sm:$0xff]  }
   0x8   :  { %1574 = vmatpush3.bf16.msra.mxu0 %v1753_v6  ;;  %v1762_v15 = vld [vmem:[%s2353_s1 + $0x98] sm:$0xff]   ;;  %v1766_v19 = vld [vmem:[%s2353_s1 + $0xa0] sm:$0xff]   ;;  %v1770_v23 = vld [vmem:[%s2353_s1 + $0xa8] sm:$0xff]  }
   0x9   :  { %1596 = vmatpush3.bf16.msra.mxu1 %v1754_v7  ;;  %1575 = vmatprep.subr.bf16.mxu0 %v1755_v8  ;;  %v1771_v24 = vld [vmem:[%s2353_s1 + $0x70] sm:$0xff]   ;;  %v1775_v28 = vld [vmem:[%s2353_s1 + $0x78] sm:$0xff]   ;;  %v24_v32 = vld [vmem:[%s2354_s0 + $0x8] sm:$0xff] }
   0xa   :  { %1597 = vmatprep.subr.bf16.mxu1 %v1756_v9  ;;  %v1772_v25 = vld [vmem:[%s2353_s1 + $0xf0] sm:$0xff]   ;;  %v1776_v29 = vld [vmem:[%s2353_s1 + $0xf8] sm:$0xff]   ;;  %v23_v34 = vld [vmem:[%s2354_s0] sm:$0xff]  ;;  %v40_v35 = vpack.c.bf16 %v24_v32, %v24_v32 }
   0xb   :  { %v1773_v26 = vld [vmem:[%s2353_s1 + $0x30] sm:$0xff]   ;;  %v1777_v30 = vld [vmem:[%s2353_s1 + $0x38] sm:$0xff]   ;;  %v39_v37 = vpack.c.bf16 %v23_v34, %v23_v34  ;;  %v1779_v40 = vld [vmem:[%s2353_s1 + $0x140] sm:$0xff]  }
   0xc   :  { %1576 = vmatpush3.bf16.msra.mxu0 %v1757_v10  ;;  %v1774_v27 = vld [vmem:[%s2353_s1 + $0xb0] sm:$0xff]   ;;  %v1778_v31 = vld [vmem:[%s2353_s1 + $0xb8] sm:$0xff]   ;;  %1118 = vmatprep.mubr.bf16.mxu0 %v40_v35  ;;  %v1780_v41 = vld [vmem:[%s2353_s1 + $0x1c0] sm:$0xff]  }
   0xd   :  { %1598 = vmatpush3.bf16.msra.mxu1 %v1758_v11  ;;  %1577 = vmatprep.subr.bf16.mxu0 %v1759_v12  ;;  %v26_v33 = vld [vmem:[%s2354_s0 + $0x18] sm:$0xff]  ;;  %v25_v38 = vld [vmem:[%s2354_s0 + $0x10] sm:$0xff]  ;;  %v1781_v42 = vld [vmem:[%s2353_s1 + $0x100] sm:$0xff]  }
   0xe   :  { %1599 = vmatprep.subr.bf16.mxu1 %v1760_v13  ;;  %v42_v36 = vpack.c.bf16 %v26_v33, %v26_v33  ;;  %v41_v39 = vpack.c.bf16 %v25_v38, %v25_v38  ;;  %v1782_v43 = vld [vmem:[%s2353_s1 + $0x180] sm:$0xff]   ;;  %v1783_v44 = vld [vmem:[%s2353_s1 + $0x148] sm:$0xff]   ;;  %v1787_v48 = vld [vmem:[%s2353_s1 + $0x150] sm:$0xff]  }
   0xf   :  { %v1784_v45 = vld [vmem:[%s2353_s1 + $0x1c8] sm:$0xff]   ;;  %v1788_v49 = vld [vmem:[%s2353_s1 + $0x1d0] sm:$0xff]   ;;  %v1791_v52 = vld [vmem:[%s2353_s1 + $0x158] sm:$0xff]  }
  0x10   :  { %1578 = vmatpush3.bf16.msra.mxu0 %v1761_v14  ;;  %1158 = vmatprep.mubr.bf16.mxu1 %v42_v36  ;;  %v1785_v46 = vld [vmem:[%s2353_s1 + $0x108] sm:$0xff]   ;;  %v1789_v50 = vld [vmem:[%s2353_s1 + $0x110] sm:$0xff]   ;;  %v1792_v53 = vld [vmem:[%s2353_s1 + $0x1d8] sm:$0xff]  }
  0x11   :  { %1600 = vmatpush3.bf16.msra.mxu1 %v1762_v15  ;;  %1579 = vmatprep.subr.bf16.mxu0 %v1763_v16  ;;  %v1786_v47 = vld [vmem:[%s2353_s1 + $0x188] sm:$0xff]   ;;  %v1790_v51 = vld [vmem:[%s2353_s1 + $0x190] sm:$0xff]   ;;  %v1793_v54 = vld [vmem:[%s2353_s1 + $0x118] sm:$0xff]  }
  0x12   :  { %1601 = vmatprep.subr.bf16.mxu1 %v1764_v17  ;;  %v1794_v55 = vld [vmem:[%s2353_s1 + $0x198] sm:$0xff]   ;;  %v1795_v56 = vld [vmem:[%s2353_s1 + $0x160] sm:$0xff]   ;;  %v1799_v60 = vld [vmem:[%s2353_s1 + $0x168] sm:$0xff]  }
  0x13   :  { %v1796_v57 = vld [vmem:[%s2353_s1 + $0x1e0] sm:$0xff]   ;;  %v1800_v61 = vld [vmem:[%s2353_s1 + $0x1e8] sm:$0xff]   ;;  %v1803_v0 = vld [vmem:[%s2353_s1 + $0x170] sm:$0xff]  }
  0x14   :  { %1580 = vmatpush3.bf16.msra.mxu0 %v1765_v18  ;;  %v1797_v58 = vld [vmem:[%s2353_s1 + $0x120] sm:$0xff]   ;;  %v1801_v62 = vld [vmem:[%s2353_s1 + $0x128] sm:$0xff]   ;;  %v1804_v1 = vld [vmem:[%s2353_s1 + $0x1f0] sm:$0xff]  }
  0x15   :  { %1602 = vmatpush3.bf16.msra.mxu1 %v1766_v19  ;;  %1581 = vmatprep.subr.bf16.mxu0 %v1767_v20  ;;  %v1798_v59 = vld [vmem:[%s2353_s1 + $0x1a0] sm:$0xff]   ;;  %v1802_v63 = vld [vmem:[%s2353_s1 + $0x1a8] sm:$0xff]   ;;  %v1805_v2 = vld [vmem:[%s2353_s1 + $0x130] sm:$0xff]  }
  0x16   :  { %1603 = vmatprep.subr.bf16.mxu1 %v1768_v21  ;;  %v1806_v3 = vld [vmem:[%s2353_s1 + $0x1b0] sm:$0xff]   ;;  %v1807_v4 = vld [vmem:[%s2353_s1 + $0x178] sm:$0xff]   ;;  %v28_v8 = vld [vmem:[%s2354_s0 + $0x28] sm:$0xff] }
  0x17   :  { %v1808_v5 = vld [vmem:[%s2353_s1 + $0x1f8] sm:$0xff]   ;;  %v44_v10 = vpack.c.bf16 %v28_v8, %v28_v8  ;;  %v27_v12 = vld [vmem:[%s2354_s0 + $0x20] sm:$0xff]  ;;  %v29_v13 = vld [vmem:[%s2354_s0 + $0x30] sm:$0xff] }
  0x18   :  { %1582 = vmatpush3.bf16.msra.mxu0 %v1769_v22  ;;  %v1809_v6 = vld [vmem:[%s2353_s1 + $0x138] sm:$0xff]   ;;  %v43_v14 = vpack.c.bf16 %v27_v12, %v27_v12  ;;  %v45_v15 = vpack.c.bf16 %v29_v13, %v29_v13  ;;  %v1811_v16 = vld [vmem:[%s2353_s1 + $0x240] sm:$0xff]   ;;  %v1815_v20 = vld [vmem:[%s2353_s1 + $0x248] sm:$0xff]  }
  0x19   :  { %1604 = vmatpush3.bf16.msra.mxu1 %v1770_v23  ;;  %1583 = vmatprep.subr.bf16.mxu0 %v1771_v24  ;;  %v1810_v7 = vld [vmem:[%s2353_s1 + $0x1b8] sm:$0xff]   ;;  %v1812_v17 = vld [vmem:[%s2353_s1 + $0x2c0] sm:$0xff]   ;;  %v1816_v21 = vld [vmem:[%s2353_s1 + $0x2c8] sm:$0xff]  }
  0x1a   :  { %1605 = vmatprep.subr.bf16.mxu1 %v1772_v25  ;;  %v30_v9 = vld [vmem:[%s2354_s0 + $0x38] sm:$0xff]  ;;  %v1813_v18 = vld [vmem:[%s2353_s1 + $0x200] sm:$0xff]   ;;  %v1817_v22 = vld [vmem:[%s2353_s1 + $0x208] sm:$0xff]  }
  0x1b   :  { %v46_v11 = vpack.c.bf16 %v30_v9, %v30_v9  ;;  %v1814_v19 = vld [vmem:[%s2353_s1 + $0x280] sm:$0xff]   ;;  %v1818_v23 = vld [vmem:[%s2353_s1 + $0x288] sm:$0xff]   ;;  %v1819_v24 = vld [vmem:[%s2353_s1 + $0x250] sm:$0xff]  }
  0x1c   :  { %1584 = vmatpush3.bf16.msra.mxu0 %v1773_v26  ;;  %v1820_v25 = vld [vmem:[%s2353_s1 + $0x2d0] sm:$0xff]   ;;  %v1827_v32 = vld [vmem:[%s2353_s1 + $0x260] sm:$0xff]   ;;  %v1831_v36 = vld [vmem:[%s2353_s1 + $0x268] sm:$0xff]  }
  0x1d   :  { %1606 = vmatpush3.bf16.msra.mxu1 %v1774_v27  ;;  %1585 = vmatprep.subr.bf16.mxu0 %v1775_v28  ;;  %v1821_v26 = vld [vmem:[%s2353_s1 + $0x210] sm:$0xff]   ;;  %v1823_v28 = vld [vmem:[%s2353_s1 + $0x258] sm:$0xff]   ;;  %v1828_v33 = vld [vmem:[%s2353_s1 + $0x2e0] sm:$0xff]  }
  0x1e   :  { %1607 = vmatprep.subr.bf16.mxu1 %v1776_v29  ;;  %v1822_v27 = vld [vmem:[%s2353_s1 + $0x290] sm:$0xff]   ;;  %v1824_v29 = vld [vmem:[%s2353_s1 + $0x2d8] sm:$0xff]   ;;  %v1829_v34 = vld [vmem:[%s2353_s1 + $0x220] sm:$0xff]  }
  0x1f   :  { %v1830_v35 = vld [vmem:[%s2353_s1 + $0x2a0] sm:$0xff]   ;;  %v1833_v38 = vld [vmem:[%s2353_s1 + $0x228] sm:$0xff]  }
  0x20   :  { %1586 = vmatpush3.bf16.msra.mxu0 %v1777_v30  ;;  %v1825_v30 = vld [vmem:[%s2353_s1 + $0x218] sm:$0xff]   ;;  %v1859_v8 = vld [vmem:[%s2353_s1 + $0x360] sm:$0xff]   ;;  %v1863_v12 = vld [vmem:[%s2353_s1 + $0x368] sm:$0xff]  }
  0x21   :  { %1608 = vmatpush3.bf16.msra.mxu1 %v1778_v31  ;;  %1615 = vmatprep.subr.bf16.mxu0 %v1779_v40  ;;  %v1826_v31 = vld [vmem:[%s2353_s1 + $0x298] sm:$0xff]   ;;  %v1835_v40 = vld [vmem:[%s2353_s1 + $0x270] sm:$0xff]   ;;  %v1860_v9 = vld [vmem:[%s2353_s1 + $0x3e0] sm:$0xff]  }
  0x22   :  { %1637 = vmatprep.subr.bf16.mxu1 %v1780_v41  ;;  %v1836_v41 = vld [vmem:[%s2353_s1 + $0x2f0] sm:$0xff]   ;;  %v1864_v13 = vld [vmem:[%s2353_s1 + $0x3e8] sm:$0xff]  }
  0x23   :  { %1119 = vmatmul.mubr.bf16.vlgmr.msra.gmra.mrb[0].mxu0 %v39_v37  ;;  %v1832_v37 = vld [vmem:[%s2353_s1 + $0x2e8] sm:$0xff]  }
  0x24   :  { %1159 = vmatmul.mubr.bf16.vlgmr.msra.gmra.mrb[0].mxu1 %v41_v39  ;;  %1616 = vmatpush3.bf16.msra.mxu0 %v1781_v42  ;;  %v1834_v39 = vld [vmem:[%s2353_s1 + $0x2a8] sm:$0xff]   ;;  %v1837_v42 = vld [vmem:[%s2353_s1 + $0x230] sm:$0xff]  }
  0x25   :  { %1638 = vmatpush3.bf16.msra.mxu1 %v1782_v43  ;;  %1617 = vmatprep.subr.bf16.mxu0 %v1783_v44  ;;  %v1838_v43 = vld [vmem:[%s2353_s1 + $0x2b0] sm:$0xff]   ;;  %v1839_v44 = vld [vmem:[%s2353_s1 + $0x278] sm:$0xff]  }
  0x26   :  { %1639 = vmatprep.subr.bf16.mxu1 %v1784_v45  ;;  %1198 = vmatprep.mubr.bf16.mxu0 %v44_v10  ;;  %v1840_v45 = vld [vmem:[%s2353_s1 + $0x2f8] sm:$0xff]   ;;  %v1861_v10 = vld [vmem:[%s2353_s1 + $0x320] sm:$0xff]  }
  0x27   :  { %1238 = vmatprep.mubr.bf16.mxu1 %v46_v11  ;;  %v1862_v11 = vld [vmem:[%s2353_s1 + $0x3a0] sm:$0xff]  }
  0x28   :  { %1618 = vmatpush3.bf16.msra.mxu0 %v1785_v46  ;;  %v1841_v46 = vld [vmem:[%s2353_s1 + $0x238] sm:$0xff]  }
  0x29   :  { %1640 = vmatpush3.bf16.msra.mxu1 %v1786_v47  ;;  %1619 = vmatprep.subr.bf16.mxu0 %v1787_v48  ;;  %v1842_v47 = vld [vmem:[%s2353_s1 + $0x2b8] sm:$0xff]   ;;  %v32_v48 = vld [vmem:[%s2354_s0 + $0x48] sm:$0xff] }
  0x2a   :  { %1641 = vmatprep.subr.bf16.mxu1 %v1788_v49  ;;  %v48_v49 = vpack.c.bf16 %v32_v48, %v32_v48 }
  0x2c   :  { %1620 = vmatpush3.bf16.msra.mxu0 %v1789_v50  ;;  %v34_v50 = vld [vmem:[%s2354_s0 + $0x58] sm:$0xff] }
  0x2d   :  { %1642 = vmatpush3.bf16.msra.mxu1 %v1790_v51  ;;  %1621 = vmatprep.subr.bf16.mxu0 %v1791_v52  ;;  %v31_v51 = vld [vmem:[%s2354_s0 + $0x40] sm:$0xff]  ;;  %v33_v52 = vld [vmem:[%s2354_s0 + $0x50] sm:$0xff] }
  0x2e   :  { %1643 = vmatprep.subr.bf16.mxu1 %v1792_v53  ;;  %v50_v53 = vpack.c.bf16 %v34_v50, %v34_v50 }
  0x30   :  { %1622 = vmatpush3.bf16.msra.mxu0 %v1793_v54  ;;  %v47_v54 = vpack.c.bf16 %v31_v51, %v31_v51 }
  0x31   :  { %1644 = vmatpush3.bf16.msra.mxu1 %v1794_v55  ;;  %1623 = vmatprep.subr.bf16.mxu0 %v1795_v56  ;;  %v49_v55 = vpack.c.bf16 %v33_v52, %v33_v52  ;;  %v1843_v56 = vld [vmem:[%s2353_s1 + $0x340] sm:$0xff]  }
  0x32   :  { %1645 = vmatprep.subr.bf16.mxu1 %v1796_v57  ;;  %v1844_v57 = vld [vmem:[%s2353_s1 + $0x3c0] sm:$0xff]  }
  0x34   :  { %1624 = vmatpush3.bf16.msra.mxu0 %v1797_v58  ;;  %v1845_v58 = vld [vmem:[%s2353_s1 + $0x300] sm:$0xff]  }
  0x35   :  { %1646 = vmatpush3.bf16.msra.mxu1 %v1798_v59  ;;  %1625 = vmatprep.subr.bf16.mxu0 %v1799_v60  ;;  %v1846_v59 = vld [vmem:[%s2353_s1 + $0x380] sm:$0xff]   ;;  %v1847_v60 = vld [vmem:[%s2353_s1 + $0x348] sm:$0xff]  }
  0x36   :  { %1647 = vmatprep.subr.bf16.mxu1 %v1800_v61  ;;  %v1848_v61 = vld [vmem:[%s2353_s1 + $0x3c8] sm:$0xff]  }
  0x38   :  { %1626 = vmatpush3.bf16.msra.mxu0 %v1801_v62  ;;  %v1849_v62 = vld [vmem:[%s2353_s1 + $0x308] sm:$0xff]  }
  0x39   :  { %1648 = vmatpush3.bf16.msra.mxu1 %v1802_v63  ;;  %1627 = vmatprep.subr.bf16.mxu0 %v1803_v0  ;;  %v1850_v63 = vld [vmem:[%s2353_s1 + $0x388] sm:$0xff]   ;;  %v1851_v0 = vld [vmem:[%s2353_s1 + $0x350] sm:$0xff]  }
  0x3a   :  { %1649 = vmatprep.subr.bf16.mxu1 %v1804_v1  ;;  %v1852_v1 = vld [vmem:[%s2353_s1 + $0x3d0] sm:$0xff]  }
  0x3c   :  { %1628 = vmatpush3.bf16.msra.mxu0 %v1805_v2  ;;  %v1853_v2 = vld [vmem:[%s2353_s1 + $0x310] sm:$0xff]  }
  0x3d   :  { %1650 = vmatpush3.bf16.msra.mxu1 %v1806_v3  ;;  %1629 = vmatprep.subr.bf16.mxu0 %v1807_v4  ;;  %v1854_v3 = vld [vmem:[%s2353_s1 + $0x390] sm:$0xff]   ;;  %v1855_v4 = vld [vmem:[%s2353_s1 + $0x358] sm:$0xff]  }
  0x3e   :  { %1651 = vmatprep.subr.bf16.mxu1 %v1808_v5  ;;  %v1856_v5 = vld [vmem:[%s2353_s1 + $0x3d8] sm:$0xff]  }
  0x40   :  { %1630 = vmatpush3.bf16.msra.mxu0 %v1809_v6  ;;  %v1857_v6 = vld [vmem:[%s2353_s1 + $0x318] sm:$0xff]  }
  0x41   :  { %1652 = vmatpush3.bf16.msra.mxu1 %v1810_v7  ;;  %1659 = vmatprep.subr.bf16.mxu0 %v1811_v16  ;;  %v1858_v7 = vld [vmem:[%s2353_s1 + $0x398] sm:$0xff]   ;;  %v1867_v16 = vld [vmem:[%s2353_s1 + $0x370] sm:$0xff]  }
  0x42   :  { %1681 = vmatprep.subr.bf16.mxu1 %v1812_v17  ;;  %v1868_v17 = vld [vmem:[%s2353_s1 + $0x3f0] sm:$0xff]  }
  0x43   :  { %1199 = vmatmul.mubr.bf16.vlgmr.msra.gmra.mrb[4].mxu0 %v43_v14  ;;  %v1865_v14 = vld [vmem:[%s2353_s1 + $0x328] sm:$0xff]  }
  0x44   :  { %1239 = vmatmul.mubr.bf16.vlgmr.msra.gmra.mrb[4].mxu1 %v45_v15  ;;  %1660 = vmatpush3.bf16.msra.mxu0 %v1813_v18  ;;  %v1866_v15 = vld [vmem:[%s2353_s1 + $0x3a8] sm:$0xff]   ;;  %v1869_v18 = vld [vmem:[%s2353_s1 + $0x330] sm:$0xff]  }
  0x45   :  { %1682 = vmatpush3.bf16.msra.mxu1 %v1814_v19  ;;  %1661 = vmatprep.subr.bf16.mxu0 %v1815_v20  ;;  %v1870_v19 = vld [vmem:[%s2353_s1 + $0x3b0] sm:$0xff]   ;;  %v1871_v20 = vld [vmem:[%s2353_s1 + $0x378] sm:$0xff]  }
  0x46   :  { %1683 = vmatprep.subr.bf16.mxu1 %v1816_v21  ;;  %1278 = vmatprep.mubr.bf16.mxu0 %v48_v49  ;;  %v1872_v21 = vld [vmem:[%s2353_s1 + $0x3f8] sm:$0xff]  }
  0x47   :  { %1318 = vmatprep.mubr.bf16.mxu1 %v50_v53 }
  0x48   :  { %1662 = vmatpush3.bf16.msra.mxu0 %v1817_v22  ;;  %v1873_v22 = vld [vmem:[%s2353_s1 + $0x338] sm:$0xff]  }
  0x49   :  { %1684 = vmatpush3.bf16.msra.mxu1 %v1818_v23  ;;  %1663 = vmatprep.subr.bf16.mxu0 %v1819_v24  ;;  %v1874_v23 = vld [vmem:[%s2353_s1 + $0x3b8] sm:$0xff]   ;;  %v36_v24 = vld [vmem:[%s2354_s0 + $0x68] sm:$0xff] }
  0x4a   :  { %1685 = vmatprep.subr.bf16.mxu1 %v1820_v25  ;;  %v38_v25 = vld [vmem:[%s2354_s0 + $0x78] sm:$0xff] }
  0x4c   :  { %1664 = vmatpush3.bf16.msra.mxu0 %v1821_v26  ;;  %v35_v26 = vld [vmem:[%s2354_s0 + $0x60] sm:$0xff] }
  0x4d   :  { %1686 = vmatpush3.bf16.msra.mxu1 %v1822_v27  ;;  %1665 = vmatprep.subr.bf16.mxu0 %v1823_v28  ;;  %v52_v27 = vpack.c.bf16 %v36_v24, %v36_v24  ;;  %v54_v28 = vpack.c.bf16 %v38_v25, %v38_v25 }
  0x4e   :  { %1687 = vmatprep.subr.bf16.mxu1 %v1824_v29  ;;  %v51_v29 = vpack.c.bf16 %v35_v26, %v35_v26 }
  0x50   :  { %1666 = vmatpush3.bf16.msra.mxu0 %v1825_v30  ;;  %v37_v30 = vld [vmem:[%s2354_s0 + $0x70] sm:$0xff] }
  0x51   :  { %1688 = vmatpush3.bf16.msra.mxu1 %v1826_v31  ;;  %1667 = vmatprep.subr.bf16.mxu0 %v1827_v32  ;;  %v53_v31 = vpack.c.bf16 %v37_v30, %v37_v30  ;;  %v10_v32 = vstv %s2355_s4 }
  0x52   :  { %1689 = vmatprep.subr.bf16.mxu1 %v1828_v33  ;;  %11 = vst [vmem:[#allocation2] sm:$0x1] %v10_v32 }
  0x54   :  { %1668 = vmatpush3.bf16.msra.mxu0 %v1829_v34 }
  0x55   :  { %1690 = vmatpush3.bf16.msra.mxu1 %v1830_v35  ;;  %1669 = vmatprep.subr.bf16.mxu0 %v1831_v36  ;;  %v1439_v35 = vld [vmem:[%s2356_s2] ss:$0 sm:$0xff] }
  0x56   :  { %1691 = vmatprep.subr.bf16.mxu1 %v1832_v37 }
  0x58   :  { %1670 = vmatpush3.bf16.msra.mxu0 %v1833_v38 }
  0x59   :  { %1692 = vmatpush3.bf16.msra.mxu1 %v1834_v39  ;;  %1671 = vmatprep.subr.bf16.mxu0 %v1835_v40 }
  0x5a   :  { %1693 = vmatprep.subr.bf16.mxu1 %v1836_v41 }
  0x5c   :  { %1672 = vmatpush3.bf16.msra.mxu0 %v1837_v42 }
  0x5d   :  { %1694 = vmatpush3.bf16.msra.mxu1 %v1838_v43  ;;  %1673 = vmatprep.subr.bf16.mxu0 %v1839_v44 }
  0x5e   :  { %1695 = vmatprep.subr.bf16.mxu1 %v1840_v45 }
  0x60   :  { %1674 = vmatpush3.bf16.msra.mxu0 %v1841_v46 }
  0x61   :  { %1696 = vmatpush3.bf16.msra.mxu1 %v1842_v47  ;;  %1703 = vmatprep.subr.bf16.mxu0 %v1843_v56 }
  0x62   :  { %1725 = vmatprep.subr.bf16.mxu1 %v1844_v57 }
  0x63   :  { %1279 = vmatmul.mubr.bf16.vlgmr.msra.gmra.mrb[8].mxu0 %v47_v54 }
  0x64   :  { %1319 = vmatmul.mubr.bf16.vlgmr.msra.gmra.mrb[8].mxu1 %v49_v55  ;;  %1704 = vmatpush3.bf16.msra.mxu0 %v1845_v58 }
  0x65   :  { %1726 = vmatpush3.bf16.msra.mxu1 %v1846_v59  ;;  %1705 = vmatprep.subr.bf16.mxu0 %v1847_v60 }
  0x66   :  { %1727 = vmatprep.subr.bf16.mxu1 %v1848_v61  ;;  %1358 = vmatprep.mubr.bf16.mxu0 %v52_v27 }
  0x67   :  { %1398 = vmatprep.mubr.bf16.mxu1 %v54_v28 }
  0x68   :  { %1706 = vmatpush3.bf16.msra.mxu0 %v1849_v62 }
  0x69   :  { %1728 = vmatpush3.bf16.msra.mxu1 %v1850_v63  ;;  %1707 = vmatprep.subr.bf16.mxu0 %v1851_v0 }
  0x6a   :  { %1729 = vmatprep.subr.bf16.mxu1 %v1852_v1 }
  0x6c   :  { %1708 = vmatpush3.bf16.msra.mxu0 %v1853_v2 }
  0x6d   :  { %1730 = vmatpush3.bf16.msra.mxu1 %v1854_v3  ;;  %1709 = vmatprep.subr.bf16.mxu0 %v1855_v4 }
  0x6e   :  { %1731 = vmatprep.subr.bf16.mxu1 %v1856_v5 }
  0x70   :  { %1710 = vmatpush3.bf16.msra.mxu0 %v1857_v6 }
  0x71   :  { %1732 = vmatpush3.bf16.msra.mxu1 %v1858_v7  ;;  %1711 = vmatprep.subr.bf16.mxu0 %v1859_v8 }
  0x72   :  { %1733 = vmatprep.subr.bf16.mxu1 %v1860_v9 }
  0x74   :  { %1712 = vmatpush3.bf16.msra.mxu0 %v1861_v10 }
  0x75   :  { %1734 = vmatpush3.bf16.msra.mxu1 %v1862_v11  ;;  %1713 = vmatprep.subr.bf16.mxu0 %v1863_v12 }
  0x76   :  { %1735 = vmatprep.subr.bf16.mxu1 %v1864_v13 }
  0x78   :  { %1714 = vmatpush3.bf16.msra.mxu0 %v1865_v14 }
  0x79   :  { %1736 = vmatpush3.bf16.msra.mxu1 %v1866_v15  ;;  %1715 = vmatprep.subr.bf16.mxu0 %v1867_v16 }
  0x7a   :  { %1737 = vmatprep.subr.bf16.mxu1 %v1868_v17 }
  0x7c   :  { %1716 = vmatpush3.bf16.msra.mxu0 %v1869_v18  ;;  %v1568_v18 = vld [vmem:[%s2357_s3] ss:$0 sm:$0xff] }
  0x7d   :  { %1738 = vmatpush3.bf16.msra.mxu1 %v1870_v19  ;;  %1717 = vmatprep.subr.bf16.mxu0 %v1871_v20 }
  0x7e   :  { %1739 = vmatprep.subr.bf16.mxu1 %v1872_v21 }
  0x80   :  { %1718 = vmatpush3.bf16.msra.mxu0 %v1873_v22  ;;  %v1569_v22 = vld [vmem:[#allocation2] ss:$0 sm:$0xff] }
  0x81   :  { %1740 = vmatpush3.bf16.msra.mxu1 %v1874_v23 }
  0x83   :  { %1359 = vmatmul.mubr.bf16.vlgmr.msra.gmra.mrb[12].mxu0 %v51_v29 }
  0x84   :  { %1399 = vmatmul.mubr.bf16.vlgmr.msra.gmra.mrb[12].mxu1 %v53_v31 }
  0xf6   :  { %v1587_v33 = vpop.f32.mrb[0].mxu0 }
  0xf7   :  { %v1609_v34 = vpop.f32.mrb[0].mxu1  ;;  %v1588_v36 = vpop.f32.mrb[1].mxu0 }
  0xf8   :  { %v1610_v37 = vpop.f32.mrb[1].mxu1  ;;  %v1589_v38 = vadd.f32 %v1588_v36, %v1587_v33  ;;  %v1590_v40 = vpop.f32.mrb[2].mxu0 }
  0xf9   :  { %v1611_v39 = vadd.f32 %v1610_v37, %v1609_v34  ;;  %v1612_v41 = vpop.f32.mrb[2].mxu1  ;;  %v1591_v42 = vpop.f32.mrb[3].mxu0 }
  0xfa   :  { %v1613_v43 = vpop.f32.mrb[3].mxu1  ;;  %v1121_v44 = vadd.f32 %v1589_v38, %v1439_v35 }
  0xfc   :  { %v1161_v45 = vadd.f32 %v1611_v39, %v1121_v44 }
 0x116   :  { %v1631_v46 = vpop.f32.mrb[4].mxu0 }
 0x117   :  { %v1653_v47 = vpop.f32.mrb[4].mxu1  ;;  %v1632_v48 = vpop.f32.mrb[5].mxu0 }
 0x118   :  { %v1633_v49 = vadd.f32 %v1632_v48, %v1631_v46  ;;  %v1654_v50 = vpop.f32.mrb[5].mxu1  ;;  %v1634_v51 = vpop.f32.mrb[6].mxu0 }
 0x119   :  { %v1655_v52 = vadd.f32 %v1654_v50, %v1653_v47  ;;  %v1656_v53 = vpop.f32.mrb[6].mxu1  ;;  %v1635_v54 = vpop.f32.mrb[7].mxu0 }
 0x11a   :  { %v1201_v55 = vadd.f32 %v1633_v49, %v1161_v45  ;;  %v1657_v56 = vpop.f32.mrb[7].mxu1 }
 0x11c   :  { %v1241_v57 = vadd.f32 %v1655_v52, %v1201_v55 }
 0x136   :  { %v1675_v58 = vpop.f32.mrb[8].mxu0 }
 0x137   :  { %v1697_v59 = vpop.f32.mrb[8].mxu1  ;;  %v1676_v60 = vpop.f32.mrb[9].mxu0 }
 0x138   :  { %v1677_v61 = vadd.f32 %v1676_v60, %v1675_v58  ;;  %v1698_v62 = vpop.f32.mrb[9].mxu1  ;;  %v1678_v63 = vpop.f32.mrb[10].mxu0 }
 0x139   :  { %v1699_v0 = vadd.f32 %v1698_v62, %v1697_v59  ;;  %v1700_v1 = vpop.f32.mrb[10].mxu1  ;;  %v1679_v2 = vpop.f32.mrb[11].mxu0 }
 0x13a   :  { %v1281_v3 = vadd.f32 %v1677_v61, %v1241_v57  ;;  %v1701_v4 = vpop.f32.mrb[11].mxu1 }
 0x13c   :  { %v1321_v5 = vadd.f32 %v1699_v0, %v1281_v3 }
 0x156   :  { %v1719_v6 = vpop.f32.mrb[12].mxu0 }
 0x157   :  { %v1741_v7 = vpop.f32.mrb[12].mxu1  ;;  %v1720_v8 = vpop.f32.mrb[13].mxu0 }
 0x158   :  { %v1742_v9 = vpop.f32.mrb[13].mxu1  ;;  %v1721_v10 = vadd.f32 %v1720_v8, %v1719_v6  ;;  %v1722_v12 = vpop.f32.mrb[14].mxu0 }
 0x159   :  { %v1743_v11 = vadd.f32 %v1742_v9, %v1741_v7  ;;  %v1744_v13 = vpop.f32.mrb[14].mxu1  ;;  %v1723_v14 = vpop.f32.mrb[15].mxu0 }
 0x15a   :  { %v1745_v15 = vpop.f32.mrb[15].mxu1  ;;  %v1361_v16 = vadd.f32 %v1721_v10, %v1321_v5 }
 0x15c   :  { %v1401_v17 = vadd.f32 %v1743_v11, %v1361_v16 }
 0x15e   :  { %v1406_v19 = vmax.f32 %v1401_v17, 0.0 }
 0x160   :  { %v1414_v20 = vmul.f32 %v1568_v18, %v1406_v19 }
 0x162   :  { %v1416_v21 = vsel %vm1415_vm0, %v1414_v20, 0.0 }
 0x163   :  { %1417 = vadd.xlane.f32.xlu0 %v1416_v21 }
 0x1f0   :  { %v1418_v23 = vpop.xlane.xlu0 %1417 }
 0x1f1   :  { %v1426_v24 = vadd.f32 %v1569_v22, %v1418_v23 }
 0x1f3   :  { %v1570_v25 = vmul.f32 -1.442695, %v1426_v24 }
 0x1f5   :  { %1875 = vpow2.f32 %v1570_v25 }
 0x1ff   :  { %v1876_v26 = vpop.eup %1875 }
 0x200   :  { %v1430_v27 = vadd.f32 1.0, %v1876_v26 }
 0x202   :  { %1877 = vrcp.f32 %v1430_v27 }
 0x20c   :  { %v1878_v28 = vpop.eup %1877 }
 0x20d   :  { %1434 = vst.msk [vmem:[%s2358_s5] sm:$0xff] %vm1433_vm1, %v1878_v28 }

</bundles_post_ra>
